<compile_context>
chip_gen: v7x
topology: tpu7x:2x2x1
jax: 0.10.0
libtpu: 0.0.40
codegen_flags: <defaults>
</compile_context>

<pallas_src>
import functools

import jax
import jax.numpy as jnp
from jax.experimental import pallas as pl
from jax.experimental.pallas import tpu as pltpu


def _round_up(x, m):
    return ((x + m - 1) // m) * m


def _cdiv(a, b):
    return (a + b - 1) // b


# -----------------------------------------------------------------------------
# Fused kernel: angle-block matmul (+ folded attention column) + LeakyReLU gate
#               + residual + LayerNorm + Softplus
# -----------------------------------------------------------------------------
def _conv_angle_kernel(ang_ref, pre_ref, w_ref, gamma_ref, beta_ref, o_ref,
                       *, a, eps, neg_slope):
    x = ang_ref[...]                                          # [TR, A] f32 (residual + LHS)

    # One MXU matmul: columns [0, A) are lin_angle's angle block, column A is
    # attention_1's angle block.  bf16 inputs, f32 accumulation.
    mm = jnp.dot(x.astype(jnp.bfloat16), w_ref[...],
                 preferred_element_type=jnp.float32)          # [TR, A_out]

    # Add the precomputed edge-side contributions (biases already folded in).
    z = pre_ref[...] + mm[:, :a + 1]                          # [TR, A+1] f32

    att = z[:, a:a + 1]                                       # attention logit (folded col)
    alpha = jnp.where(att >= 0.0, att, neg_slope * att)       # LeakyReLU(0.01)

    # Gated message + f32 residual.
    y = x + alpha * z[:, :a]                                  # [TR, A] f32

    # LayerNorm over the (unpadded) feature axis — no lane masking needed.
    mean = jnp.mean(y, axis=-1, keepdims=True)
    d = y - mean
    var = jnp.mean(d * d, axis=-1, keepdims=True)
    out = d * jax.lax.rsqrt(var + eps) * gamma_ref[...] + beta_ref[...]

    # Softplus, numerically stable.  (Output kept f32 for torch parity; switch the
    # out_shape dtype to bf16 on v6e/v7x if downstream consumers accept it.)
    out = jnp.maximum(out, 0.0) + jnp.log(1.0 + jnp.exp(-jnp.abs(out)))
    o_ref[...] = out.astype(o_ref.dtype)


# -----------------------------------------------------------------------------
# Wrapper: weight split + tiny edge projections + nbr gather in XLA, then one
# tiled pallas_call over the flattened (N*M*M) row axis.
# -----------------------------------------------------------------------------
def conv_angle_forward(params, angle_fea, edge_fea, nbr_idx, *, row_tile=512):
    N, M, M2, A = angle_fea.shape
    assert M2 == M
    E = edge_fea.shape[-1]
    rows = N * M * M
    hp = jax.lax.Precision.HIGHEST

    # --- split the dense weights into their concat row blocks ------------------
    w_lin = params["w_lin"]                    # [2E+A, A]
    w_att = params["w_att"]                    # [2E+A]
    w_eij, w_eik, w_ang = w_lin[:E], w_lin[E:2 * E], w_lin[2 * E:]
    wa_eij, wa_eik, wa_ang = w_att[:E], w_att[E:2 * E], w_att[2 * E:]

    # --- tiny edge-side projections ([N*M, A] instead of [rows, 2E]) -----------
    edge2d = edge_fea.reshape(N * M, E)
    p1 = jnp.dot(edge2d, w_eij, precision=hp).reshape(N, M, 1, A)   # eij block
    p2 = jnp.dot(edge2d, w_eik, precision=hp).reshape(N, M, A)      # eik block
    a1 = jnp.dot(edge2d, wa_eij, precision=hp).reshape(N, M, 1)
    a2 = jnp.dot(edge2d, wa_eik, precision=hp).reshape(N, M)

    # --- data-dependent neighbor gather of the A-wide projections (XLA) --------
    p2g = p2[nbr_idx]                          # [N, M, M, A]
    a2g = a2[nbr_idx]                          # [N, M, M]

    # Edge contributions + biases, attention folded into the last column.
    pre_lin = (p1 + p2g + params["b_lin"]).reshape(rows, A)
    pre_att = (a1 + a2g + params["b_att"]).reshape(rows, 1)
    pre = jnp.concatenate([pre_lin, pre_att], axis=-1)               # [rows, A+1] f32

    # Resident combined weight: [A, A_out] bf16, column A carries w_att's angle block.
    A_out = _round_up(A + 1, 128)
    wcomb = jnp.zeros((A, A_out), jnp.bfloat16)
    wcomb = wcomb.at[:, :A].set(w_ang.astype(jnp.bfloat16))
    wcomb = wcomb.at[:, A].set(wa_ang.astype(jnp.bfloat16))

    ang2d = angle_fea.reshape(rows, A).astype(jnp.float32)
    gamma = params["gamma"].reshape(1, A).astype(jnp.float32)
    beta = params["beta"].reshape(1, A).astype(jnp.float32)

    # --- row tiling -------------------------------------------------------------
    TR = min(_round_up(row_tile, 8), _round_up(rows, 8))
    # Keep >= 4 grid steps when the problem is big enough (v7x megacore: 2 TCs x
    # double-buffered pipeline) without dropping below the ~128-row overhead knee.
    if rows >= 4 * 128:
        TR = min(TR, max(128, _round_up(_cdiv(rows, 4), 8)))
    grid = (_cdiv(rows, TR),)

    # VMEM budget (double-buffered streamed tiles + resident weights) — comfortably
    # inside the 32 MiB scoped limit on every generation at these sizes.
    vmem_bytes = 32 * 1024 * 1024

    kern = functools.partial(_conv_angle_kernel, a=A, eps=1e-5, neg_slope=0.01)
    out = pl.pallas_call(
        kern,
        out_shape=jax.ShapeDtypeStruct((rows, A), jnp.float32),
        grid=grid,
        in_specs=[
            pl.BlockSpec((TR, A), lambda i: (i, 0)),        # angle_fea (f32, residual+LHS)
            pl.BlockSpec((TR, A + 1), lambda i: (i, 0)),    # edge pre-accumulation (+att col)
            pl.BlockSpec((A, A_out), lambda i: (0, 0)),     # combined weight (bf16), resident
            pl.BlockSpec((1, A), lambda i: (0, 0)),         # LayerNorm gamma
            pl.BlockSpec((1, A), lambda i: (0, 0)),         # LayerNorm beta
        ],
        out_specs=pl.BlockSpec((TR, A), lambda i: (i, 0)),
        compiler_params=pltpu.CompilerParams(
            dimension_semantics=("parallel",),
            vmem_limit_bytes=vmem_bytes),
    )(ang2d, pre, wcomb, gamma, beta)

    return out.reshape(N, M, M, A)


# -----------------------------------------------------------------------------
# Parameter init (PyTorch Linear-style uniform init; LayerNorm gamma=1, beta=0)
# -----------------------------------------------------------------------------
def init_params(key, edge_fea_len, angle_fea_len):
    fin = angle_fea_len + 2 * edge_fea_len
    ks = jax.random.split(key, 4)
    bound = 1.0 / (fin ** 0.5)
    return {
        "w_lin": jax.random.uniform(ks[0], (fin, angle_fea_len), jnp.float32, -bound, bound),
        "b_lin": jax.random.uniform(ks[1], (angle_fea_len,), jnp.float32, -bound, bound),
        "w_att": jax.random.uniform(ks[2], (fin,), jnp.float32, -bound, bound),
        "b_att": jax.random.uniform(ks[3], (1,), jnp.float32, -bound, bound),
        "gamma": jnp.ones((angle_fea_len,), jnp.float32),
        "beta": jnp.zeros((angle_fea_len,), jnp.float32),
    }


# -----------------------------------------------------------------------------
# Pure-JAX torch-parity reference (full f32, concatenated-feature path)
# -----------------------------------------------------------------------------
def conv_angle_reference(params, angle_fea, edge_fea, nbr_idx):
    N, M, _, A = angle_fea.shape
    E = edge_fea.shape[-1]
    hp = jax.lax.Precision.HIGHEST
    eij = jnp.broadcast_to(edge_fea[:, :, None, :], (N, M, M, E))
    eik = edge_fea[nbr_idx]
    cat = jnp.concatenate([eij, eik, angle_fea], axis=-1)
    lin = jnp.dot(cat, params["w_lin"], precision=hp) + params["b_lin"]
    att = jnp.dot(cat, params["w_att"], precision=hp)[..., None] + params["b_att"]
    alpha = jnp.where(att >= 0.0, att, 0.01 * att)
    y = angle_fea + alpha * lin
    mean = jnp.mean(y, axis=-1, keepdims=True)
    var = jnp.mean((y - mean) ** 2, axis=-1, keepdims=True)
    out = (y - mean) * jax.lax.rsqrt(var + 1e-5) * params["gamma"] + params["beta"]
    return jnp.maximum(out, 0.0) + jnp.log(1.0 + jnp.exp(-jnp.abs(out)))


# -----------------------------------------------------------------------------
if __name__ == "__main__":
    # Small deterministic configuration.  The torch `expand` in the reference module
    # requires edge_fea_len == angle_fea_len.
    N, M = 32, 4          # rows = N*M*M = 512 -> 4 grid steps of 128 rows
    E = A = 64

    key = jax.random.PRNGKey(0)
    k1, k2, k3, k4 = jax.random.split(key, 4)
    angle_fea = jax.random.normal(k1, (N, M, M, A), dtype=jnp.float32)
    edge_fea = jax.random.normal(k2, (N, M, E), dtype=jnp.float32)
    nbr_idx = jax.random.randint(k3, (N, M), 0, N)
    params = init_params(k4, E, A)

    fwd = jax.jit(conv_angle_forward)
    out = jax.block_until_ready(fwd(params, angle_fea, edge_fea, nbr_idx))

    assert out.shape == (N, M, M, A)
    assert bool(jnp.all(jnp.isfinite(out)))
    ref = conv_angle_reference(params, angle_fea, edge_fea, nbr_idx)
    max_err = float(jnp.max(jnp.abs(out - ref)))
    # Only the angle block of the fused matmul runs in bf16 (f32 accumulation);
    # everything else is f32, so the error vs. the full-f32 reference stays small.
    assert max_err < 3e-2, f"max abs error {max_err}"
    print("KERNEL_OK")
</pallas_src>

<mosaic_0001>
module attributes {stable_mosaic.version = 11 : i64} {
  func.func @_conv_angle_kernel(%arg0: i32, %arg1: memref<128x64xf32, #tpu.memory_space<vmem>>, %arg2: memref<128x65xf32, #tpu.memory_space<vmem>>, %arg3: memref<64x128xbf16, #tpu.memory_space<vmem>>, %arg4: memref<1x64xf32, #tpu.memory_space<vmem>>, %arg5: memref<1x64xf32, #tpu.memory_space<vmem>>, %arg6: memref<128x64xf32, #tpu.memory_space<vmem>>) attributes {dimension_semantics = [#tpu.dimension_semantics<parallel>], iteration_bounds = array<i64: 4>, scalar_prefetch = 0 : i64, scratch_operands = 0 : i64, tpu.core_type = #tpu.core_type<tc>, window_params = [{transform_indices = @transform_0, window_bounds = array<i64: 128, 64>}, {transform_indices = @transform_1, window_bounds = array<i64: 128, 65>}, {pipeline_mode = #tpu.pipeline_mode<synchronous>, transform_indices = @transform_2, window_bounds = array<i64: 64, 128>}, {pipeline_mode = #tpu.pipeline_mode<synchronous>, transform_indices = @transform_3, window_bounds = array<i64: 1, 64>}, {pipeline_mode = #tpu.pipeline_mode<synchronous>, transform_indices = @transform_4, window_bounds = array<i64: 1, 64>}, {transform_indices = @transform_5, window_bounds = array<i64: 128, 64>}]} {
    %c0 = arith.constant 0 : index
    %c0_0 = arith.constant 0 : index
    %0 = vector.load %arg1[%c0, %c0_0] : memref<128x64xf32, #tpu.memory_space<vmem>>, vector<128x64xf32>
    %1 = arith.truncf %0 : vector<128x64xf32> to vector<128x64xbf16>
    %c0_1 = arith.constant 0 : index
    %c0_2 = arith.constant 0 : index
    %2 = vector.load %arg3[%c0_1, %c0_2] : memref<64x128xbf16, #tpu.memory_space<vmem>>, vector<64x128xbf16>
    %cst = arith.constant dense<0.000000e+00> : vector<128x128xf32>
    %3 = tpu.matmul %1, %2, %cst {dimension_numbers = #tpu.dot_dimension_numbers<[1], [0], [0], [1], [0, 0, 1, 1], [], []>} : vector<128x64xbf16>, vector<64x128xbf16>, vector<128x128xf32> -> vector<128x128xf32>
    %c0_3 = arith.constant 0 : index
    %c0_4 = arith.constant 0 : index
    %4 = vector.load %arg2[%c0_3, %c0_4] : memref<128x65xf32, #tpu.memory_space<vmem>>, vector<128x65xf32>
    %5 = vector.extract_strided_slice %3 {offsets = [0, 0], sizes = [128, 65], strides = [1, 1]} : vector<128x128xf32> to vector<128x65xf32>
    %6 = arith.addf %4, %5 : vector<128x65xf32>
    %7 = vector.extract_strided_slice %6 {offsets = [0, 64], sizes = [128, 1], strides = [1, 1]} : vector<128x65xf32> to vector<128x1xf32>
    %cst_5 = arith.constant 0.000000e+00 : f32
    %8 = vector.broadcast %cst_5 : f32 to vector<128x1xf32>
    %9 = arith.cmpf oge, %7, %8 : vector<128x1xf32>
    %cst_6 = arith.constant 0.00999999977 : f32
    %10 = vector.broadcast %cst_6 : f32 to vector<128x1xf32>
    %11 = arith.mulf %10, %7 : vector<128x1xf32>
    %12 = arith.select %9, %7, %11 : vector<128x1xi1>, vector<128x1xf32>
    %13 = vector.extract_strided_slice %6 {offsets = [0, 0], sizes = [128, 64], strides = [1, 1]} : vector<128x65xf32> to vector<128x64xf32>
    %14 = vector.broadcast %12 : vector<128x1xf32> to vector<128x64xf32>
    %15 = arith.mulf %14, %13 : vector<128x64xf32>
    %16 = arith.addf %0, %15 : vector<128x64xf32>
    %cst_7 = arith.constant dense<0.000000e+00> : vector<128xf32>
    %17 = vector.multi_reduction <add>, %16, %cst_7 [1] : vector<128x64xf32> to vector<128xf32>
    %18 = vector.shape_cast %17 : vector<128xf32> to vector<128x1xf32>
    %cst_8 = arith.constant 6.400000e+01 : f32
    %19 = vector.broadcast %cst_8 : f32 to vector<128x1xf32>
    %20 = arith.divf %18, %19 : vector<128x1xf32>
    %21 = vector.broadcast %20 : vector<128x1xf32> to vector<128x64xf32>
    %22 = arith.subf %16, %21 : vector<128x64xf32>
    %23 = arith.mulf %22, %22 : vector<128x64xf32>
    %cst_9 = arith.constant dense<0.000000e+00> : vector<128xf32>
    %24 = vector.multi_reduction <add>, %23, %cst_9 [1] : vector<128x64xf32> to vector<128xf32>
    %25 = vector.shape_cast %24 : vector<128xf32> to vector<128x1xf32>
    %cst_10 = arith.constant 6.400000e+01 : f32
    %26 = vector.broadcast %cst_10 : f32 to vector<128x1xf32>
    %27 = arith.divf %25, %26 : vector<128x1xf32>
    %cst_11 = arith.constant 9.99999974E-6 : f32
    %28 = vector.broadcast %cst_11 : f32 to vector<128x1xf32>
    %29 = arith.addf %27, %28 : vector<128x1xf32>
    %30 = math.rsqrt %29 : vector<128x1xf32>
    %31 = vector.broadcast %30 : vector<128x1xf32> to vector<128x64xf32>
    %32 = arith.mulf %22, %31 : vector<128x64xf32>
    %c0_12 = arith.constant 0 : index
    %c0_13 = arith.constant 0 : index
    %33 = vector.load %arg4[%c0_12, %c0_13] : memref<1x64xf32, #tpu.memory_space<vmem>>, vector<1x64xf32>
    %34 = vector.broadcast %33 : vector<1x64xf32> to vector<128x64xf32>
    %35 = arith.mulf %32, %34 : vector<128x64xf32>
    %c0_14 = arith.constant 0 : index
    %c0_15 = arith.constant 0 : index
    %36 = vector.load %arg5[%c0_14, %c0_15] : memref<1x64xf32, #tpu.memory_space<vmem>>, vector<1x64xf32>
    %37 = vector.broadcast %36 : vector<1x64xf32> to vector<128x64xf32>
    %38 = arith.addf %35, %37 : vector<128x64xf32>
    %cst_16 = arith.constant 0.000000e+00 : f32
    %39 = vector.broadcast %cst_16 : f32 to vector<128x64xf32>
    %40 = arith.maximumf %38, %39 : vector<128x64xf32>
    %41 = math.absf %38 : vector<128x64xf32>
    %cst_17 = arith.constant 0.000000e+00 : f32
    %42 = vector.broadcast %cst_17 : f32 to vector<128x64xf32>
    %43 = arith.subf %42, %41 : vector<128x64xf32>
    %44 = math.exp %43 : vector<128x64xf32>
    %cst_18 = arith.constant 1.000000e+00 : f32
    %45 = vector.broadcast %cst_18 : f32 to vector<128x64xf32>
    %46 = arith.addf %45, %44 : vector<128x64xf32>
    %47 = math.log %46 : vector<128x64xf32>
    %48 = arith.addf %40, %47 : vector<128x64xf32>
    %c0_19 = arith.constant 0 : index
    %c0_20 = arith.constant 0 : index
    %49 = vector.load %arg6[%c0_19, %c0_20] : memref<128x64xf32, #tpu.memory_space<vmem>>, vector<128x64xf32>
    tpu.vector_store %arg6[%c0_19, %c0_20], %48 {strides = array<i32>} : memref<128x64xf32, #tpu.memory_space<vmem>>, vector<128x64xf32>,
    return
  }
  func.func @transform_0(%arg0: i32) -> (i32, i32) {
    %c0_i32 = arith.constant 0 : i32
    %c0_i32_0 = arith.constant 0 : i32
    return %arg0, %c0_i32 : i32, i32
  }
  func.func @transform_1(%arg0: i32) -> (i32, i32) {
    %c0_i32 = arith.constant 0 : i32
    %c0_i32_0 = arith.constant 0 : i32
    return %arg0, %c0_i32 : i32, i32
  }
  func.func @transform_2(%arg0: i32) -> (i32, i32) {
    %c0_i32 = arith.constant 0 : i32
    %c0_i32_0 = arith.constant 0 : i32
    %c0_i32_1 = arith.constant 0 : i32
    return %c0_i32, %c0_i32_0 : i32, i32
  }
  func.func @transform_3(%arg0: i32) -> (i32, i32) {
    %c0_i32 = arith.constant 0 : i32
    %c0_i32_0 = arith.constant 0 : i32
    %c0_i32_1 = arith.constant 0 : i32
    return %c0_i32, %c0_i32_0 : i32, i32
  }
  func.func @transform_4(%arg0: i32) -> (i32, i32) {
    %c0_i32 = arith.constant 0 : i32
    %c0_i32_0 = arith.constant 0 : i32
    %c0_i32_1 = arith.constant 0 : i32
    return %c0_i32, %c0_i32_0 : i32, i32
  }
  func.func @transform_5(%arg0: i32) -> (i32, i32) {
    %c0_i32 = arith.constant 0 : i32
    %c0_i32_0 = arith.constant 0 : i32
    return %arg0, %c0_i32 : i32, i32
  }
}

</mosaic_0001>

<bundles_post_ra>
// kernel: conv_angle_forward.1
= control target key start
LH: loop header
LB: loop body
LE: loop exit
PB: predicated region body
PF: predicated region fallthrough
CT: control target
= control target key end

     0   :  { %10 = vsyncpa [#allocation3], 0  ;;  %s2082_s0 = inlined_call_operand.vmem [shape: f32[512,64], index: 0, kind: input, shape index: {}]   ;;  %s2083_s1 = inlined_call_operand.vmem [shape: f32[512,65], index: 1, kind: input, shape index: {}]   ;;  %s2084_s2 = inlined_call_operand.vmem [shape: bf16[64,128], index: 2, kind: input, shape index: {}]   ;;  %s2085_s3 = inlined_call_operand.vmem [shape: f32[1,64], index: 3, kind: input, shape index: {}]   ;;  %s2086_s4 = inlined_call_operand.vmem [shape: f32[1,64], index: 4, kind: input, shape index: {}]   ;;  %s2087_s5 = inlined_call_operand.hbm [shape: f32[512,64], index: 5, kind: output, shape index: {}]  }
   0x1   :  { %12 = vsyncpa [#allocation3 + $0x1], 0  ;;  %s1437_s18 = smov 0   ;;  %s1439_s19 = smov 0  }
   0x2   :  { %s1441_s20 = smov 0   ;;  %s1443_s21 = smov 0  }
   0x3 LB: > { %s1458_s22 = sadd.s32 4294967295, %s1401_s21   ;;  %s1122_s23 = sadd.s32 4294967294, %s1401_s21   ;;  %s1401_s21 = sphi %s1443_s21, %s2093_s21   ;;  %s1397_s20 = sphi %s1441_s20, %s2092_s20   ;;  %s1393_s19 = sphi %s1439_s19, %s2091_s19   ;;  %s1389_s18 = sphi %s1437_s18, %s2090_s18  }
   0x4   : > { %s1462_s24 = sadd.s32 1, %s1401_s21   ;;  %s140_s25 = sadd.s32 1, %s1397_s20 }
   0x5   : > { %s137_s26 = ssub.s32 %s1401_s21, %s1462_s24  ;;  %p150_p0 = scmp.ne.s32.totalorder %s1397_s20, %s1393_s19 }
   0x6   : > { %p138_p1 = scmp.eq.s32.totalorder %s137_s26, 0  ;;  %p151_p2 = scmp.eq.s32.totalorder %s1458_s22, 3 }
   0x7   : > { %p156_p3 = scmp.ne.s32.totalorder %s1393_s19, %s1389_s18  ;;  %p157_p4 = scmp.eq.s32.totalorder %s1122_s23, 3 }
   0x8   : > { %s1473_s27 = scalar_select %p138_p1, %s1397_s20, %s140_s25  }
   0x9   : > { %p1475_p5 = por %p151_p2, %p150_p0  ;;  %p1479_p6 = por %p157_p4, %p156_p3 }
   0xa   : > { %p1125_p7 = scmp.ge.s32.totalorder %s1401_s21, 1  ;;  %p202_p8 = scmp.lt.s32.totalorder %s1401_s21, 5 }
   0xc   : > { %p203_p9 = pnand %p1125_p7, %p202_p8 }
   0xd   : > { %v1239_v0 = vld [vmem:[%s2084_s2] sm:$0xff] (!%p203_p9)   ;;  %s1127_s7 = sshll.u32 (!%p203_p9), %s1458_s22, 4  ;;  %v1240_v1 = vld [vmem:[%s2084_s2 + $0x8] sm:$0xff] (!%p203_p9)   ;;  %v1241_v2 = vld [vmem:[%s2084_s2 + $0x10] sm:$0xff] (!%p203_p9)   ;;  %vm305_vm0 = vcmask (!%p203_p9), 523264   ;;  %v1403_v28 = vmov (!%p203_p9), 64  }
   0xe   : > { %206 = sbr.rel (%p203_p9) target bundleno = 799 (0x31f), region = 40  ;;  %p236_p10 = scmp.lt.s32.totalorder (!%p203_p9), %s1127_s7, 63  ;;  %1163 = vmatprep.subr.bf16.mxu0 (!%p203_p9), %v1239_v0  ;;  %1187 = vmatprep.subr.bf16.mxu1 (!%p203_p9), %v1239_v0  ;;  %v1242_v6 = vld [vmem:[%s2084_s2 + $0x18] sm:$0xff] (!%p203_p9)  }
   0xf   : > { %1164 = vmatpush3.bf16.msra.mxu0 (!%p203_p9), %v1239_v0  ;;  %1191 = vmatpush3.bf16.msra.mxu1 (!%p203_p9), %v1239_v0  ;;  %s232_s9 = sand.u32 (!%p203_p9), 1, %s1393_s19   ;;  %s1404_s23 = smov (!%p203_p9), [#allocation2]  }
  0x10   : > { %1165 = vmatprep.subr.bf16.mxu0 (!%p203_p9), %v1240_v1  ;;  %1188 = vmatprep.subr.bf16.mxu1 (!%p203_p9), %v1240_v1  ;;  %s1126_s10 = sshll.u32 (!%p203_p9), %s232_s9, 7  ;;  %s1343_s25 = sshll.u32 (!%p203_p9), %s1404_s23, 4  ;;  %s1344_s25 = int_to_ptr.vmem [resolvable:$false] %s1343_s25 }
  0x11   : > { %1238 = vset.pattern.permute.xlu0 (!%p203_p9), %v1403_v28  ;;  %1237 = vset.pattern.permute.xlu1 (!%p203_p9), %v1403_v28  ;;  %s1959_s11 = scalar_lea.vmem (!%p203_p9), [#allocation2], %s1126_s10 }
  0x12   : > { %s1048_s13 = sshll.u32 (!%p203_p9), %s1959_s11, 4  ;;  %s2035_s13 = int_to_ptr.vmem [resolvable:$true] %s1048_s13 }
  0x13   : > { %1166 = vmatpush3.bf16.msra.mxu0 (!%p203_p9), %v1240_v1  ;;  %1192 = vmatpush3.bf16.msra.mxu1 (!%p203_p9), %v1240_v1  ;;  %s1339_s17 = scalar_lea.vmem (!%p203_p9), %s2035_s13, 2048  ;;  %p1346_p0 = scmp.lt.s32.totalorder (!%p203_p9), %s2035_s13, %s1344_s25 }
  0x14   : > { %1167 = vmatprep.subr.bf16.mxu0 (!%p203_p9), %v1241_v2  ;;  %1189 = vmatprep.subr.bf16.mxu1 (!%p203_p9), %v1241_v2  ;;  %p1340_p11 = scmp.ne.s32.totalorder (!%p203_p9), %s2035_s13, %s1339_s17 }
  0x15   : > { %s2095_s7 = smov (!%p236_p10, %s1127_s7), 63 }
  0x16   : > { %s1128_s12 = sshll.u32 %s2095_s7, 3  ;;  %p1341_p12 = pnand %p1340_p11, %p1475_p5 }
  0x17   : > { %s1503_s15 = scalar_lea.vmem %s2082_s0, %s1128_s12  ;;  %1168 = vmatpush3.bf16.msra.mxu0 %v1241_v2  ;;  %1193 = vmatpush3.bf16.msra.mxu1 %v1241_v2  ;;  %s1585_s26 = scalar_lea.vmem %s2083_s1, %s1128_s12 }
  0x18   : > { %v1506_v3 = vld [vmem:[%s1503_s15] sm:$0xff]  ;;  %v1509_v4 = vld [vmem:[%s1503_s15 + $0x8] sm:$0xff]  ;;  %v1526_v10 = vld [vmem:[%s1503_s15 + $0x10] sm:$0xff]  ;;  %1169 = vmatprep.subr.bf16.mxu0 %v1242_v6  ;;  %1190 = vmatprep.subr.bf16.mxu1 %v1242_v6  ;;  %s1150_s12 = sshll.u32 %s1458_s22, 11  ;;  %s2041_s22 = scalar_lea.sflag [#allocation3], %s232_s9 }
  0x19   : > { %v1512_v5 = vld [vmem:[%s1503_s15 + $0x40] sm:$0xff]  ;;  %v265_v7 = vpack.c.bf16 %v1509_v4, %v1506_v3  ;;  %v1520_v8 = vld [vmem:[%s1503_s15 + $0x48] sm:$0xff]  ;;  %v1529_v11 = vld [vmem:[%s1503_s15 + $0x18] sm:$0xff]  ;;  %s2033_s16 = scalar_lea.hbm %s2087_s5, %s1150_s12  ;;  %p1342_p13 = pneg %p1341_p12 }
  0x1a   : > { %v269_v9 = vpack.c.bf16 %v1520_v8, %v1512_v5  ;;  %v1532_v12 = vld [vmem:[%s1503_s15 + $0x50] sm:$0xff]  ;;  %v1535_v13 = vld [vmem:[%s1503_s15 + $0x58] sm:$0xff]  ;;  %v1538_v14 = vld [vmem:[%s1503_s15 + $0x20] sm:$0xff]  ;;  %v266_v18 = vpack.c.bf16 %v1529_v11, %v1526_v10 }
  0x1b   : > { %1171 = vmatprep.mubr.msk.bf16.mxu0 %vm305_vm0, %v265_v7  ;;  %v1541_v15 = vld [vmem:[%s1503_s15 + $0x28] sm:$0xff]  ;;  %v1544_v16 = vld [vmem:[%s1503_s15 + $0x60] sm:$0xff]  ;;  %v270_v19 = vpack.c.bf16 %v1535_v13, %v1532_v12  ;;  %1170 = vmatpush3.bf16.msra.mxu0 %v1242_v6  ;;  %v1561_v22 = vld [vmem:[%s1503_s15 + $0x30] sm:$0xff] }
  0x1c   : > { %v1547_v17 = vld [vmem:[%s1503_s15 + $0x68] sm:$0xff]  ;;  %1179 = vmatprep.mubr.msk.bf16.mxu1 %vm305_vm0, %v269_v9  ;;  %1194 = vmatpush3.bf16.msra.mxu1 %v1242_v6  ;;  %v267_v20 = vpack.c.bf16 %v1541_v15, %v1538_v14  ;;  %v1565_v23 = vld [vmem:[%s1503_s15 + $0x38] sm:$0xff]  ;;  %v1569_v24 = vld [vmem:[%s1503_s15 + $0x70] sm:$0xff] }
  0x1d   : > { %v271_v21 = vpack.c.bf16 %v1547_v17, %v1544_v16  ;;  %v1572_v25 = vld [vmem:[%s1503_s15 + $0x78] sm:$0xff]  ;;  %v268_v26 = vpack.c.bf16 %v1565_v23, %v1561_v22  ;;  %v429_v29 = vld [vmem:[%s1585_s26 + $0x10] sm:$0xff]  ;;  %v427_v31 = vld [vmem:[%s1585_s26] sm:$0xff] }
  0x1e   : > { %1172 = vmatmul.mubr.msk.bf16.vlgmr.msra.gmra.mrb[0].mxu0 %vm305_vm0, %v266_v18  ;;  %v272_v27 = vpack.c.bf16 %v1572_v25, %v1569_v24  ;;  %v437_v30 = vld [vmem:[%s1585_s26 + $0x50] sm:$0xff]  ;;  %v435_v32 = vld [vmem:[%s1585_s26 + $0x40] sm:$0xff]  ;;  %v430_v35 = vld [vmem:[%s1585_s26 + $0x18] sm:$0xff] }
  0x1f   : > { %1180 = vmatmul.mubr.msk.bf16.vlgmr.msra.gmra.mrb[0].mxu1 %vm305_vm0, %v270_v19  ;;  %1175 = vmatprep.mubr.msk.bf16.mxu0 %vm305_vm0, %v267_v20  ;;  %v438_v36 = vld [vmem:[%s1585_s26 + $0x58] sm:$0xff]  ;;  %v428_v41 = vld [vmem:[%s1585_s26 + $0x8] sm:$0xff]  ;;  %v433_v59 = vld [vmem:[%s1585_s26 + $0x30] sm:$0xff] }
  0x20   : > { %1183 = vmatprep.mubr.msk.bf16.mxu1 %vm305_vm0, %v271_v21  ;;  %v436_v42 = vld [vmem:[%s1585_s26 + $0x48] sm:$0xff]  ;;  %v441_v60 = vld [vmem:[%s1585_s26 + $0x70] sm:$0xff]  ;;  %v431_v61 = vld [vmem:[%s1585_s26 + $0x20] sm:$0xff] }
  0x21   : > { %v439_v62 = vld [vmem:[%s1585_s26 + $0x60] sm:$0xff]  ;;  %v434_v0 = vld [vmem:[%s1585_s26 + $0x38] sm:$0xff]  ;;  %v432_v19 = vld [vmem:[%s1585_s26 + $0x28] sm:$0xff] }
  0x22   : > { %v442_v2 = vld [vmem:[%s1585_s26 + $0x78] sm:$0xff] }
  0x26   : > { %1176 = vmatmul.mubr.msk.bf16.gmra.mrb[4].mxu0 %vm305_vm0, %v268_v26  ;;  %v440_v26 = vld [vmem:[%s1585_s26 + $0x68] sm:$0xff]  ;;  %s1345_s26 = scalar_lea.vmem %s1344_s25, 4096 }
  0x27   : > { %1184 = vmatmul.mubr.msk.bf16.gmra.mrb[4].mxu1 %vm305_vm0, %v272_v27  ;;  %p1347_p1 = scmp.lt.s32.totalorder %s1345_s26, %s1339_s17 }
  0x29   : > { %p1348_p2 = por %p1347_p1, %p1346_p0 }
  0x2b   : > { %p1349_p3 = pnand %p1348_p2, %p1342_p13 }
  0xf1   : > { %v1173_v33 = vpop.f32.mrb[0].mxu0 }
  0xf2   : > { %v1181_v34 = vpop.f32.mrb[0].mxu1  ;;  %v1593_v37 = vadd.f32 %v1173_v33, %v429_v29  ;;  %v364_v39 = vpop.f32.mrb[1].mxu0 }
  0xf3   : > { %v1595_v38 = vadd.f32 %v1181_v34, %v437_v30  ;;  %v396_v40 = vpop.f32.mrb[1].mxu1  ;;  %v1599_v43 = vadd.f32 %v427_v31, %v364_v39  ;;  %v1174_v45 = vpop.f32.mrb[2].mxu0 }
  0xf4   : > { %v1601_v44 = vadd.f32 %v435_v32, %v396_v40  ;;  %v1182_v46 = vpop.f32.mrb[2].mxu1  ;;  %v1603_v47 = vadd.f32 %v1174_v45, %v430_v35  ;;  %v367_v49 = vpop.f32.mrb[3].mxu0  ;;  %vm461_vm2 = vcmp.ge.f32.partialorder %v1593_v37, 0.0  ;;  %v477_v54 = vmul.f32 0.01, %v1593_v37 }
  0xf5   : > { %v1605_v48 = vadd.f32 %v1182_v46, %v438_v36  ;;  %v399_v50 = vpop.f32.mrb[3].mxu1  ;;  %vm469_vm1 = vcmp.ge.f32.partialorder %v1595_v38, 0.0  ;;  %v485_v51 = vmul.f32 0.01, %v1595_v38  ;;  %v1609_v52 = vadd.f32 %v428_v41, %v367_v49 }
  0xf6   : > { %v1611_v53 = vadd.f32 %v436_v42, %v399_v50  ;;  %v475_v56 = vmul.f32 0.01, %v1599_v43  ;;  %v493_v57 = vsel %vm461_vm2, %v1593_v37, %v477_v54  ;;  %vm459_vm3 = vcmp.ge.f32.partialorder %v1599_v43, 0.0 }
  0xf7   : > { %v501_v55 = vsel %vm469_vm1, %v1595_v38, %v485_v51  ;;  %v478_v58 = vmul.f32 0.01, %v1603_v47  ;;  %519 = vperm.xlu1 %1237, %v493_v57   ;;  %vm462_vm4 = vcmp.ge.f32.partialorder %v1603_v47, 0.0  ;;  %vm467_vm5 = vcmp.ge.f32.partialorder %v1601_v44, 0.0 }
  0xf8   : > { %559 = vperm.xlu0 %1238, %v501_v55   ;;  %v491_v6 = vsel %vm459_vm3, %v1599_v43, %v475_v56  ;;  %v483_v7 = vmul.f32 0.01, %v1601_v44  ;;  %v486_v28 = vmul.f32 0.01, %v1605_v48  ;;  %vm470_vm6 = vcmp.ge.f32.partialorder %v1605_v48, 0.0 }
  0xf9   : > { %v1177_v63 = vpop.f32.mrb[4].mxu0  ;;  %v494_v27 = vsel %vm462_vm4, %v1603_v47, %v478_v58  ;;  %v476_v42 = vmul.f32 0.01, %v1609_v52  ;;  %v484_v46 = vmul.f32 0.01, %v1611_v53  ;;  %vm460_vm7 = vcmp.ge.f32.partialorder %v1609_v52, 0.0 }
  0xfa   : > { %v1185_v1 = vpop.f32.mrb[4].mxu1  ;;  %v1630_v9 = vadd.f32 %v1177_v63, %v433_v59  ;;  %v380_v18 = vpop.f32.mrb[5].mxu0  ;;  %v499_v41 = vsel %vm467_vm5, %v1601_v44, %v483_v7  ;;  %v502_v45 = vsel %vm470_vm6, %v1605_v48, %v486_v28  ;;  %vm468_vm8 = vcmp.ge.f32.partialorder %v1611_v53, 0.0 }
  0xfb   : > { %v1633_v20 = vadd.f32 %v1185_v1, %v441_v60  ;;  %v412_v21 = vpop.f32.mrb[5].mxu1  ;;  %v1640_v29 = vadd.f32 %v431_v61, %v380_v18  ;;  %v1178_v30 = vpop.f32.mrb[6].mxu0  ;;  %524 = vperm.xlu1 %1237, %v494_v27   ;;  %v492_v51 = vsel %vm460_vm7, %v1609_v52, %v476_v42  ;;  %v500_v54 = vsel %vm468_vm8, %v1611_v53, %v484_v46 }
  0xfc   : > { %509 = vperm.xlu0 %1238, %v491_v6   ;;  %v1642_v31 = vadd.f32 %v439_v62, %v412_v21  ;;  %v1186_v32 = vpop.f32.mrb[6].mxu1  ;;  %v1645_v33 = vadd.f32 %v1178_v30, %v434_v0  ;;  %v383_v34 = vpop.f32.mrb[7].mxu0  ;;  %v481_v49 = vmul.f32 0.01, %v1630_v9  ;;  %vm465_vm9 = vcmp.ge.f32.partialorder %v1630_v9, 0.0 }
  0xfd   : > { %v1647_v35 = vadd.f32 %v1186_v32, %v442_v2  ;;  %v415_v36 = vpop.f32.mrb[7].mxu1  ;;  %v1649_v39 = vadd.f32 %v432_v19, %v383_v34  ;;  %v489_v56 = vmul.f32 0.01, %v1633_v20  ;;  %vm473_vm11 = vcmp.ge.f32.partialorder %v1633_v20, 0.0 }
  0xfe   : > { %v1651_v40 = vadd.f32 %v440_v26, %v415_v36  ;;  %v482_v50 = vmul.f32 0.01, %v1645_v33  ;;  %vm466_vm10 = vcmp.ge.f32.partialorder %v1645_v33, 0.0  ;;  %v497_v55 = vsel %vm465_vm9, %v1630_v9, %v481_v49 }
  0xff   : > { %564 = vperm.xlu1 %1237, %v502_v45   ;;  %v480_v58 = vmul.f32 0.01, %v1649_v39  ;;  %v505_v59 = vsel %vm473_vm11, %v1633_v20, %v489_v56  ;;  %vm464_vm12 = vcmp.ge.f32.partialorder %v1649_v39, 0.0  ;;  %v479_v60 = vmul.f32 0.01, %v1640_v29 }
 0x100   : > { %549 = vperm.xlu0 %1238, %v499_v41   ;;  %v498_v57 = vsel %vm466_vm10, %v1645_v33, %v482_v50  ;;  %vm463_vm13 = vcmp.ge.f32.partialorder %v1640_v29, 0.0  ;;  %v488_v62 = vmul.f32 0.01, %v1651_v40  ;;  %vm472_vm14 = vcmp.ge.f32.partialorder %v1651_v40, 0.0 }
 0x101   : > { %v496_v61 = vsel %vm464_vm12, %v1649_v39, %v480_v58  ;;  %v495_v63 = vsel %vm463_vm13, %v1640_v29, %v479_v60  ;;  %v487_v0 = vmul.f32 0.01, %v1642_v31  ;;  %vm471_vm15 = vcmp.ge.f32.partialorder %v1642_v31, 0.0 }
 0x102   : > { %v504_v1 = vsel %vm472_vm14, %v1651_v40, %v488_v62  ;;  %v490_v2 = vmul.f32 0.01, %v1647_v35  ;;  %vm474_vm1 = vcmp.ge.f32.partialorder %v1647_v35, 0.0 }
 0x103   : > { %554 = vperm.xlu1 %1237, %v500_v54   ;;  %v503_v6 = vsel %vm471_vm15, %v1642_v31, %v487_v0 }
 0x104   : > { %514 = vperm.xlu0 %1238, %v492_v51   ;;  %v506_v7 = vsel %vm474_vm1, %v1647_v35, %v490_v2 }
 0x107   : > { %544 = vperm.xlu1 %1237, %v498_v57  }
 0x108   : > { %539 = vperm.xlu0 %1238, %v497_v55  }
 0x10b   : > { %534 = vperm.xlu1 %1237, %v496_v61  }
 0x10c   : > { %579 = vperm.xlu0 %1238, %v505_v59  }
 0x10f   : > { %574 = vperm.xlu1 %1237, %v504_v1  }
 0x110   : > { %529 = vperm.xlu0 %1238, %v495_v63  }
 0x113   : > { %584 = vperm.xlu1 %1237, %v506_v7  }
 0x114   : > { %569 = vperm.xlu0 %1238, %v503_v6  }
 0x176   : > { %v520_v21 = vpop.permute.xlu1 %519 }
 0x177   : > { %v560_v18 = vpop.permute.xlu0 %559  ;;  %v589_v26 = vmul.f32 %v520_v21, %v1593_v37 }
 0x178   : > { %v597_v19 = vmul.f32 %v560_v18, %v1595_v38 }
 0x179   : > { %v1693_v30 = vadd.f32 %v589_v26, %v1526_v10 }
 0x17a   : > { %v1690_v27 = vadd.f32 %v597_v19, %v1532_v12  ;;  %v525_v34 = vpop.permute.xlu1 %524 }
 0x17b   : > { %v510_v28 = vpop.permute.xlu0 %509  ;;  %v590_v41 = vmul.f32 %v525_v34, %v1603_v47  ;;  %v625_v38 = vsel %vm305_vm0, %v1693_v30, 0.0 }
 0x17c   : > { %v587_v32 = vmul.f32 %v510_v28, %v1599_v43  ;;  %v649_v36 = vsel %vm305_vm0, %v1690_v27, 0.0  ;;  %626 = vadd.xlane.f32.xlu0 %v625_v38 }
 0x17d   : > { %650 = vadd.xlane.f32.xlu1 %v649_v36  ;;  %v1709_v46 = vadd.f32 %v590_v41, %v1529_v11 }
 0x17e   : > { %v1702_v12 = vadd.f32 %v587_v32, %v1506_v3  ;;  %v565_v42 = vpop.permute.xlu1 %564 }
 0x17f   : > { %v550_v37 = vpop.permute.xlu0 %549  ;;  %v598_v45 = vmul.f32 %v565_v42, %v1605_v48  ;;  %v628_v54 = vsel %vm305_vm0, %v1709_v46, 0.0 }
 0x180   : > { %v595_v10 = vmul.f32 %v550_v37, %v1601_v44  ;;  %v619_v43 = vsel %vm305_vm0, %v1702_v12, 0.0 }
 0x181   : > { %620 = vadd.xlane.f32.xlu0 %v619_v43  ;;  %v1721_v11 = vadd.f32 %v598_v45, %v1535_v13 }
 0x182   : > { %v1712_v47 = vadd.f32 %v595_v10, %v1512_v5  ;;  %v555_v50 = vpop.permute.xlu1 %554 }
 0x183   : > { %v515_v49 = vpop.permute.xlu0 %514  ;;  %v596_v51 = vmul.f32 %v555_v50, %v1611_v53  ;;  %v652_v57 = vsel %vm305_vm0, %v1721_v11, 0.0 }
 0x184   : > { %v588_v3 = vmul.f32 %v515_v49, %v1609_v52  ;;  %v643_v44 = vsel %vm305_vm0, %v1712_v47, 0.0 }
 0x185   : > { %644 = vadd.xlane.f32.xlu1 %v643_v44  ;;  %629 = vadd.xlane.f32.xlu0 %v628_v54  ;;  %v1733_v13 = vadd.f32 %v596_v51, %v1520_v8 }
 0x186   : > { %v1724_v5 = vadd.f32 %v588_v3, %v1509_v4  ;;  %v545_v52 = vpop.permute.xlu1 %544 }
 0x187   : > { %v540_v48 = vpop.permute.xlu0 %539  ;;  %v594_v53 = vmul.f32 %v545_v52, %v1645_v33  ;;  %v646_v33 = vsel %vm305_vm0, %v1733_v13, 0.0 }
 0x188   : > { %v593_v55 = vmul.f32 %v540_v48, %v1630_v9  ;;  %v622_v56 = vsel %vm305_vm0, %v1724_v5, 0.0 }
 0x189   : > { %623 = vadd.xlane.f32.xlu1 %v622_v56  ;;  %653 = vadd.xlane.f32.xlu0 %v652_v57  ;;  %v1744_v61 = vadd.f32 %v594_v53, %v1565_v23 }
 0x18a   : > { %v1736_v4 = vadd.f32 %v593_v55, %v1561_v22  ;;  %v535_v59 = vpop.permute.xlu1 %534 }
 0x18b   : > { %v580_v58 = vpop.permute.xlu0 %579  ;;  %v592_v60 = vmul.f32 %v535_v59, %v1649_v39  ;;  %v640_v0 = vsel %vm305_vm0, %v1744_v61, 0.0 }
 0x18c   : > { %v637_v9 = vsel %vm305_vm0, %v1736_v4, 0.0  ;;  %v601_v23 = vmul.f32 %v580_v58, %v1633_v20 }
 0x18d   : > { %638 = vadd.xlane.f32.xlu1 %v637_v9  ;;  %647 = vadd.xlane.f32.xlu0 %v646_v33  ;;  %v1751_v1 = vadd.f32 %v592_v60, %v1541_v15 }
 0x18e   : > { %v575_v22 = vpop.permute.xlu1 %574 }
 0x18f   : > { %v530_v8 = vpop.permute.xlu0 %529  ;;  %v600_v63 = vmul.f32 %v575_v22, %v1651_v40  ;;  %v634_v15 = vsel %vm305_vm0, %v1751_v1, 0.0 }
 0x190   : > { %v591_v62 = vmul.f32 %v530_v8, %v1640_v29 }
 0x191   : > { %641 = vadd.xlane.f32.xlu0 %v640_v0  ;;  %v1764_v18 = vadd.f32 %v600_v63, %v1547_v17 }
 0x192   : > { %v1754_v39 = vadd.f32 %v591_v62, %v1538_v14  ;;  %v585_v7 = vpop.permute.xlu1 %584 }
 0x193   : > { %v570_v2 = vpop.permute.xlu0 %569  ;;  %v602_v40 = vmul.f32 %v585_v7, %v1647_v35  ;;  %v658_v35 = vsel %vm305_vm0, %v1764_v18, 0.0 }
 0x194   : > { %v599_v6 = vmul.f32 %v570_v2, %v1642_v31  ;;  %v631_v29 = vsel %vm305_vm0, %v1754_v39, 0.0  ;;  %v1772_v31 = vadd.f32 %v601_v23, %v1569_v24 }
 0x195   : > { %632 = vadd.xlane.f32.xlu1 %v631_v29  ;;  %635 = vadd.xlane.f32.xlu0 %v634_v15  ;;  %v1777_v19 = vadd.f32 %v602_v40, %v1572_v25 }
 0x196   : > { %v1767_v14 = vadd.f32 %v599_v6, %v1544_v16  ;;  %v661_v17 = vsel %vm305_vm0, %v1772_v31, 0.0 }
 0x197   : > { %v664_v16 = vsel %vm305_vm0, %v1777_v19, 0.0 }
 0x198   : > { %v655_v20 = vsel %vm305_vm0, %v1767_v14, 0.0 }
 0x199   : > { %656 = vadd.xlane.f32.xlu1 %v655_v20  ;;  %659 = vadd.xlane.f32.xlu0 %v658_v35 }
 0x19d   : > { %662 = vadd.xlane.f32.xlu1 %v661_v17  ;;  %665 = vadd.xlane.f32.xlu0 %v664_v16 }
 0x209   : > { %v627_v26 = vpop.xlane.xlu0 %626 }
 0x20a   : > { %v651_v21 = vpop.xlane.xlu1 %650  ;;  %v670_v28 = vmul.f32 0.015625, %v627_v26 }
 0x20b   : > { %v678_v24 = vmul.f32 0.015625, %v651_v21 }
 0x20c   : > { %v1784_v32 = vsub.f32 %v1693_v30, %v670_v28 }
 0x20d   : > { %v1787_v34 = vsub.f32 %v1690_v27, %v678_v24 }
 0x20e   : > { %v621_v25 = vpop.xlane.xlu0 %620  ;;  %v702_v41 = vmul.f32 %v1784_v32, %v1784_v32 }
 0x20f   : > { %v668_v36 = vmul.f32 0.015625, %v621_v25  ;;  %v710_v42 = vmul.f32 %v1787_v34, %v1787_v34 }
 0x210   : > { %v722_v37 = vsel %vm305_vm0, %v702_v41, 0.0 }
 0x211   : > { %v1792_v38 = vsub.f32 %v1702_v12, %v668_v36  ;;  %723 = vadd.xlane.f32.xlu1 %v722_v37  ;;  %v746_v12 = vsel %vm305_vm0, %v710_v42, 0.0 }
 0x212   : > { %v645_v10 = vpop.xlane.xlu1 %644  ;;  %v630_v43 = vpop.xlane.xlu0 %629 }
 0x213   : > { %v676_v30 = vmul.f32 0.015625, %v645_v10  ;;  %v671_v45 = vmul.f32 0.015625, %v630_v43  ;;  %v700_v27 = vmul.f32 %v1792_v38, %v1792_v38 }
 0x215   : > { %v1800_v49 = vsub.f32 %v1709_v46, %v671_v45  ;;  %v1803_v50 = vsub.f32 %v1712_v47, %v676_v30  ;;  %747 = vadd.xlane.f32.xlu1 %v746_v12  ;;  %v716_v55 = vsel %vm305_vm0, %v700_v27, 0.0 }
 0x216   : > { %v624_v3 = vpop.xlane.xlu1 %623  ;;  %v654_v44 = vpop.xlane.xlu0 %653 }
 0x217   : > { %v669_v51 = vmul.f32 0.015625, %v624_v3  ;;  %v679_v54 = vmul.f32 0.015625, %v654_v44  ;;  %v703_v48 = vmul.f32 %v1800_v49, %v1800_v49  ;;  %v708_v53 = vmul.f32 %v1803_v50, %v1803_v50 }
 0x219   : > { %v1810_v52 = vsub.f32 %v1721_v11, %v679_v54  ;;  %v1813_v46 = vsub.f32 %v1724_v5, %v669_v51  ;;  %v725_v47 = vsel %vm305_vm0, %v703_v48, 0.0  ;;  %717 = vadd.xlane.f32.xlu1 %v716_v55  ;;  %v740_v33 = vsel %vm305_vm0, %v708_v53, 0.0 }
 0x21a   : > { %v639_v56 = vpop.xlane.xlu1 %638  ;;  %v648_v57 = vpop.xlane.xlu0 %647  ;;  %726 = vadd.xlane.f32.xlu0 %v725_v47 }
 0x21b   : > { %v674_v58 = vmul.f32 0.015625, %v639_v56  ;;  %v677_v59 = vmul.f32 0.015625, %v648_v57  ;;  %v711_v9 = vmul.f32 %v1810_v52, %v1810_v52  ;;  %v701_v8 = vmul.f32 %v1813_v46, %v1813_v46 }
 0x21d   : > { %v1821_v11 = vsub.f32 %v1736_v4, %v674_v58  ;;  %v1824_v5 = vsub.f32 %v1733_v13, %v677_v59  ;;  %v749_v60 = vsel %vm305_vm0, %v711_v9, 0.0  ;;  %741 = vadd.xlane.f32.xlu1 %v740_v33  ;;  %v719_v13 = vsel %vm305_vm0, %v701_v8, 0.0 }
 0x21e   : > { %v642_v62 = vpop.xlane.xlu0 %641  ;;  %750 = vadd.xlane.f32.xlu0 %v749_v60 }
 0x21f   : > { %v706_v22 = vmul.f32 %v1821_v11, %v1821_v11  ;;  %v675_v63 = vmul.f32 0.015625, %v642_v62  ;;  %v709_v23 = vmul.f32 %v1824_v5, %v1824_v5 }
 0x221   : > { %v734_v4 = vsel %vm305_vm0, %v706_v22, 0.0  ;;  %v1834_v0 = vsub.f32 %v1744_v61, %v675_v63  ;;  %v743_v61 = vsel %vm305_vm0, %v709_v23, 0.0  ;;  %v1882_v63 = vld [vmem:[%s2085_s3] ss:$0 sm:$0xff] }
 0x222   : > { %v633_v2 = vpop.xlane.xlu1 %632  ;;  %v636_v6 = vpop.xlane.xlu0 %635  ;;  %720 = vadd.xlane.f32.xlu0 %v719_v13  ;;  %735 = vadd.xlane.f32.xlu1 %v734_v4 }
 0x223   : > { %v672_v7 = vmul.f32 0.015625, %v633_v2  ;;  %v673_v29 = vmul.f32 0.015625, %v636_v6  ;;  %v707_v35 = vmul.f32 %v1834_v0, %v1834_v0 }
 0x225   : > { %v1840_v40 = vsub.f32 %v1754_v39, %v672_v7  ;;  %v1843_v15 = vsub.f32 %v1751_v1, %v673_v29  ;;  %v737_v28 = vsel %vm305_vm0, %v707_v35, 0.0  ;;  %v1888_v7 = vld [vmem:[%s2086_s4] ss:$0 sm:$0xff] }
 0x226   : > { %v657_v20 = vpop.xlane.xlu1 %656  ;;  %v660_v17 = vpop.xlane.xlu0 %659  ;;  %744 = vadd.xlane.f32.xlu0 %v743_v61 }
 0x227   : > { %v680_v16 = vmul.f32 0.015625, %v657_v20  ;;  %v704_v21 = vmul.f32 %v1840_v40, %v1840_v40  ;;  %v681_v26 = vmul.f32 0.015625, %v660_v17  ;;  %v705_v36 = vmul.f32 %v1843_v15, %v1843_v15 }
 0x229   : > { %v1851_v24 = vsub.f32 %v1767_v14, %v680_v16  ;;  %v728_v39 = vsel %vm305_vm0, %v704_v21, 0.0  ;;  %v1855_v1 = vsub.f32 %v1764_v18, %v681_v26  ;;  %v731_v30 = vsel %vm305_vm0, %v705_v36, 0.0 }
 0x22a   : > { %729 = vadd.xlane.f32.xlu1 %v728_v39  ;;  %v663_v25 = vpop.xlane.xlu1 %662  ;;  %v666_v41 = vpop.xlane.xlu0 %665  ;;  %738 = vadd.xlane.f32.xlu0 %v737_v28 }
 0x22b   : > { %v682_v37 = vmul.f32 0.015625, %v663_v25  ;;  %v712_v10 = vmul.f32 %v1851_v24, %v1851_v24  ;;  %v683_v14 = vmul.f32 0.015625, %v666_v41  ;;  %v713_v45 = vmul.f32 %v1855_v1, %v1855_v1 }
 0x22d   : > { %v1863_v42 = vsub.f32 %v1772_v31, %v682_v37  ;;  %v752_v18 = vsel %vm305_vm0, %v712_v10, 0.0  ;;  %v1867_v43 = vsub.f32 %v1777_v19, %v683_v14  ;;  %v755_v31 = vsel %vm305_vm0, %v713_v45, 0.0 }
 0x22e   : > { %753 = vadd.xlane.f32.xlu1 %v752_v18  ;;  %732 = vadd.xlane.f32.xlu0 %v731_v30 }
 0x22f   : > { %v714_v27 = vmul.f32 %v1863_v42, %v1863_v42  ;;  %v715_v3 = vmul.f32 %v1867_v43, %v1867_v43 }
 0x231   : > { %v758_v12 = vsel %vm305_vm0, %v714_v27, 0.0  ;;  %v761_v19 = vsel %vm305_vm0, %v715_v3, 0.0 }
 0x232   : > { %759 = vadd.xlane.f32.xlu1 %v758_v12  ;;  %756 = vadd.xlane.f32.xlu0 %v755_v31 }
 0x236   : > { %762 = vadd.xlane.f32.xlu0 %v761_v19 }
 0x29e   : > { %v724_v44 = vpop.xlane.xlu1 %723 }
 0x29f   : > { %v766_v51 = vmul.f32 0.015625, %v724_v44 }
 0x2a1   : > { %v782_v54 = vadd.f32 1e-05, %v766_v51 }
 0x2a2   : > { %v748_v48 = vpop.xlane.xlu1 %747 }
 0x2a3   : > { %1243 = vrsqrt.f32 %v782_v54  ;;  %v774_v55 = vmul.f32 0.015625, %v748_v48 }
 0x2a5   : > { %v790_v47 = vadd.f32 1e-05, %v774_v55 }
 0x2a6   : > { %v718_v53 = vpop.xlane.xlu1 %717 }
 0x2a7   : > { %v727_v56 = vpop.xlane.xlu0 %726  ;;  %1245 = vrsqrt.f32 %v790_v47  ;;  %v764_v58 = vmul.f32 0.015625, %v718_v53 }
 0x2a8   : > { %v767_v57 = vmul.f32 0.015625, %v727_v56 }
 0x2a9   : > { %v780_v9 = vadd.f32 1e-05, %v764_v58 }
 0x2aa   : > { %v783_v59 = vadd.f32 1e-05, %v767_v57  ;;  %v742_v33 = vpop.xlane.xlu1 %741 }
 0x2ab   : > { %v751_v60 = vpop.xlane.xlu0 %750  ;;  %v772_v62 = vmul.f32 0.015625, %v742_v33 }
 0x2ac   : > { %1247 = vrsqrt.f32 %v783_v59  ;;  %v775_v8 = vmul.f32 0.015625, %v751_v60 }
 0x2ad   : > { %1249 = vrsqrt.f32 %v780_v9  ;;  %v1244_v22 = vpop.eup %1243  ;;  %v788_v13 = vadd.f32 1e-05, %v772_v62 }
 0x2ae   : > { %v791_v4 = vadd.f32 1e-05, %v775_v8  ;;  %v814_v2 = vmul.f32 %v1244_v22, %v1784_v32 }
 0x2af   : > { %v721_v23 = vpop.xlane.xlu0 %720  ;;  %v736_v6 = vpop.xlane.xlu1 %735 }
 0x2b0   : > { %1251 = vrsqrt.f32 %v791_v4  ;;  %v765_v29 = vmul.f32 0.015625, %v721_v23  ;;  %v770_v61 = vmul.f32 0.015625, %v736_v6  ;;  %v837_v20 = vmul.f32 %v1882_v63, %v814_v2 }
 0x2b1   : > { %1253 = vrsqrt.f32 %v788_v13  ;;  %v1246_v35 = vpop.eup %1245 }
 0x2b2   : > { %v781_v17 = vadd.f32 1e-05, %v765_v29  ;;  %v786_v16 = vadd.f32 1e-05, %v770_v61  ;;  %v1892_v21 = vadd.f32 %v1888_v7, %v837_v20  ;;  %v822_v32 = vmul.f32 %v1246_v35, %v1787_v34 }
 0x2b3   : > { %v745_v26 = vpop.xlane.xlu0 %744 }
 0x2b4   : > { %1255 = vrsqrt.f32 %v781_v17  ;;  %v773_v39 = vmul.f32 0.015625, %v745_v26  ;;  %v892_v28 = vand.u32 2147483647, %v1892_v21  ;;  %v845_v25 = vmul.f32 %v1882_v63, %v822_v32 }
 0x2b5   : > { %1257 = vrsqrt.f32 %v786_v16 }
 0x2b6   : > { %v1248_v36 = vpop.eup %1247  ;;  %v789_v41 = vadd.f32 1e-05, %v773_v39  ;;  %v908_v14 = vsub.f32 0.0, %v892_v28  ;;  %v1898_v18 = vadd.f32 %v1888_v7, %v845_v25 }
 0x2b7   : > { %v730_v37 = vpop.xlane.xlu1 %729  ;;  %v1250_v10 = vpop.eup %1249  ;;  %v815_v30 = vmul.f32 %v1248_v36, %v1800_v49 }
 0x2b8   : > { %v739_v45 = vpop.xlane.xlu0 %738  ;;  %v768_v34 = vmul.f32 0.015625, %v730_v37  ;;  %v812_v27 = vmul.f32 %v1250_v10, %v1792_v38  ;;  %1259 = vrsqrt.f32 %v789_v41  ;;  %v926_v31 = vmul.f32 1.442695, %v908_v14 }
 0x2b9   : > { %v771_v12 = vmul.f32 0.015625, %v739_v45  ;;  %v900_v3 = vand.u32 2147483647, %v1898_v18  ;;  %v838_v19 = vmul.f32 %v1882_v63, %v815_v30 }
 0x2ba   : > { %v1252_v44 = vpop.eup %1251  ;;  %v835_v51 = vmul.f32 %v1882_v63, %v812_v27  ;;  %v784_v48 = vadd.f32 1e-05, %v768_v34  ;;  %1261 = vpow2.f32 %v926_v31 }
 0x2bb   : > { %v787_v54 = vadd.f32 1e-05, %v771_v12  ;;  %v1254_v55 = vpop.eup %1253  ;;  %v916_v47 = vsub.f32 0.0, %v900_v3  ;;  %v1906_v49 = vadd.f32 %v1888_v7, %v838_v19  ;;  %v823_v38 = vmul.f32 %v1252_v44, %v1810_v52  ;;  %v754_v12 = vpop.xlane.xlu1 %753 }
 0x2bc   : > { %v1910_v56 = vadd.f32 %v1888_v7, %v835_v51  ;;  %v820_v53 = vmul.f32 %v1254_v55, %v1803_v50  ;;  %v733_v14 = vpop.xlane.xlu0 %732 }
 0x2bd   : > { %1263 = vrsqrt.f32 %v787_v54  ;;  %v942_v57 = vmul.f32 1.442695, %v916_v47  ;;  %v893_v58 = vand.u32 2147483647, %v1906_v49  ;;  %v846_v59 = vmul.f32 %v1882_v63, %v823_v38 }
 0x2be   : > { %v1256_v9 = vpop.eup %1255  ;;  %v890_v60 = vand.u32 2147483647, %v1910_v56  ;;  %v843_v33 = vmul.f32 %v1882_v63, %v820_v53  ;;  %1265 = vrsqrt.f32 %v784_v48  ;;  %v769_v44 = vmul.f32 0.015625, %v733_v14 }
 0x2bf   : > { %v1258_v8 = vpop.eup %1257  ;;  %1267 = vpow2.f32 %v942_v57  ;;  %v909_v52 = vsub.f32 0.0, %v893_v58  ;;  %v1918_v62 = vadd.f32 %v1888_v7, %v846_v59  ;;  %v813_v50 = vmul.f32 %v1256_v9, %v1813_v46 }
 0x2c0   : > { %v906_v22 = vsub.f32 0.0, %v890_v60  ;;  %v1922_v4 = vadd.f32 %v1888_v7, %v843_v33  ;;  %v818_v13 = vmul.f32 %v1258_v8, %v1821_v11  ;;  %v757_v57 = vpop.xlane.xlu0 %756  ;;  %v785_v8 = vadd.f32 1e-05, %v769_v44 }
 0x2c1   : > { %v928_v2 = vmul.f32 1.442695, %v909_v52  ;;  %v901_v23 = vand.u32 2147483647, %v1918_v62  ;;  %v836_v6 = vmul.f32 %v1882_v63, %v813_v50 }
 0x2c2   : > { %v1260_v29 = vpop.eup %1259  ;;  %v922_v61 = vmul.f32 1.442695, %v906_v22  ;;  %v898_v20 = vand.u32 2147483647, %v1922_v4  ;;  %v841_v35 = vmul.f32 %v1882_v63, %v818_v13 }
 0x2c3   : > { %1269 = vpow2.f32 %v928_v2  ;;  %v917_v17 = vsub.f32 0.0, %v901_v23  ;;  %v1930_v46 = vadd.f32 %v1888_v7, %v836_v6  ;;  %v821_v16 = vmul.f32 %v1260_v29, %v1824_v5  ;;  %v760_v2 = vpop.xlane.xlu1 %759 }
 0x2c4   : > { %1271 = vpow2.f32 %v922_v61  ;;  %v914_v11 = vsub.f32 0.0, %v898_v20  ;;  %v1934_v32 = vadd.f32 %v1888_v7, %v841_v35  ;;  %v1262_v26 = vpop.eup %1261  ;;  %v777_v6 = vmul.f32 0.015625, %v757_v57 }
 0x2c5   : > { %v944_v39 = vmul.f32 1.442695, %v917_v17  ;;  %v891_v28 = vand.u32 2147483647, %v1930_v46  ;;  %v844_v25 = vmul.f32 %v1882_v63, %v821_v16  ;;  %v956_v41 = vadd.f32 1.0, %v1262_v26  ;;  %v763_v17 = vpop.xlane.xlu0 %762 }
 0x2c6   : > { %v938_v37 = vmul.f32 1.442695, %v914_v11  ;;  %v896_v10 = vand.u32 2147483647, %v1934_v32  ;;  %v876_v11 = vmax.f32 %v1892_v21, 0.0  ;;  %v884_v21 = vmax.f32 %v1898_v18, 0.0 }
 0x2c7   : > { %v1264_v36 = vpop.eup %1263  ;;  %1273 = vpow2.f32 %v944_v39  ;;  %v907_v30 = vsub.f32 0.0, %v891_v28  ;;  %v1940_v5 = vadd.f32 %v1888_v7, %v844_v25  ;;  %v778_v39 = vmul.f32 0.015625, %v760_v2 }
 0x2c8   : > { %v819_v45 = vmul.f32 %v1264_v36, %v1834_v0  ;;  %v1266_v34 = vpop.eup %1265  ;;  %1275 = vlog2.f32 %v956_v41  ;;  %v912_v27 = vsub.f32 0.0, %v896_v10  ;;  %v776_v0 = vmul.f32 0.015625, %v754_v12 }
 0x2c9   : > { %v1268_v31 = vpop.eup %1267  ;;  %1277 = vpow2.f32 %v938_v37  ;;  %v924_v3 = vmul.f32 1.442695, %v907_v30  ;;  %v899_v19 = vand.u32 2147483647, %v1940_v5  ;;  %v816_v55 = vmul.f32 %v1266_v34, %v1840_v40 }
 0x2ca   : > { %v964_v51 = vadd.f32 1.0, %v1268_v31  ;;  %v934_v54 = vmul.f32 1.442695, %v912_v27  ;;  %v842_v48 = vmul.f32 %v1882_v63, %v819_v45  ;;  %v792_v50 = vadd.f32 1e-05, %v776_v0 }
 0x2cb   : > { %1279 = vpow2.f32 %v924_v3  ;;  %v915_v47 = vsub.f32 0.0, %v899_v19  ;;  %v839_v53 = vmul.f32 %v1882_v63, %v816_v55  ;;  %v793_v37 = vadd.f32 1e-05, %v777_v6 }
 0x2cc   : > { %1281 = vlog2.f32 %v964_v51  ;;  %v1947_v38 = vadd.f32 %v1888_v7, %v842_v48  ;;  %v779_v10 = vmul.f32 0.015625, %v763_v17  ;;  %v794_v27 = vadd.f32 1e-05, %v778_v39 }
 0x2cd   : > { %v1270_v58 = vpop.eup %1269  ;;  %1283 = vpow2.f32 %v934_v54  ;;  %v940_v59 = vmul.f32 1.442695, %v915_v47  ;;  %v1953_v40 = vadd.f32 %v1888_v7, %v839_v53  ;;  %v877_v48 = vmax.f32 %v1906_v49, 0.0 }
 0x2ce   : > { %v1272_v9 = vpop.eup %1271  ;;  %v957_v60 = vadd.f32 1.0, %v1270_v58  ;;  %v897_v33 = vand.u32 2147483647, %v1947_v38  ;;  %v795_v19 = vadd.f32 1e-05, %v779_v10  ;;  %v874_v47 = vmax.f32 %v1910_v56, 0.0 }
 0x2cf   : > { %v954_v52 = vadd.f32 1.0, %v1272_v9  ;;  %1285 = vpow2.f32 %v940_v59  ;;  %v894_v13 = vand.u32 2147483647, %v1953_v40  ;;  %v885_v49 = vmax.f32 %v1918_v62, 0.0 }
 0x2d0   : > { %1287 = vlog2.f32 %v957_v60  ;;  %v913_v22 = vsub.f32 0.0, %v897_v33  ;;  %v882_v2 = vmax.f32 %v1922_v4, 0.0 }
 0x2d1   : > { %v1274_v23 = vpop.eup %1273  ;;  %1289 = vlog2.f32 %v954_v52  ;;  %v910_v35 = vsub.f32 0.0, %v894_v13 }
 0x2d2   : > { %v1276_v29 = vpop.eup %1275  ;;  %v965_v61 = vadd.f32 1.0, %v1274_v23  ;;  %v936_v20 = vmul.f32 1.442695, %v913_v22  ;;  %1291 = vrsqrt.f32 %v785_v8 }
 0x2d3   : > { %v1278_v16 = vpop.eup %1277  ;;  %v975_v26 = vmul.f32 0.6931472, %v1276_v29  ;;  %1293 = vrsqrt.f32 %v792_v50  ;;  %v930_v25 = vmul.f32 1.442695, %v910_v35  ;;  %v875_v35 = vmax.f32 %v1930_v46, 0.0 }
 0x2d4   : > { %1295 = vlog2.f32 %v965_v61  ;;  %v962_v28 = vadd.f32 1.0, %v1278_v16 }
 0x2d5   : > { %v1280_v36 = vpop.eup %1279  ;;  %v1004_v41 = vadd.f32 %v975_v26, %v876_v11  ;;  %1297 = vpow2.f32 %v936_v20 }
 0x2d6   : > { %v1282_v14 = vpop.eup %1281  ;;  %1299 = vlog2.f32 %v962_v28  ;;  %v955_v30 = vadd.f32 1.0, %v1280_v36 }
 0x2d7   : > { %v1284_v45 = vpop.eup %1283  ;;  %1020 = vst.msk [vmem:[%s1959_s11 + $0x10] sm:$0xff] %vm305_vm0, %v1004_v41  ;;  %v991_v34 = vmul.f32 0.6931472, %v1282_v14  ;;  %1301 = vpow2.f32 %v930_v25  ;;  %v880_v25 = vmax.f32 %v1934_v32, 0.0 }
 0x2d8   : > { %1303 = vlog2.f32 %v955_v30  ;;  %v960_v12 = vadd.f32 1.0, %v1284_v45  ;;  %v883_v45 = vmax.f32 %v1940_v5, 0.0 }
 0x2d9   : > { %v1286_v31 = vpop.eup %1285  ;;  %v1012_v3 = vadd.f32 %v991_v34, %v884_v21  ;;  %1305 = vrsqrt.f32 %v793_v37 }
 0x2da   : > { %v1288_v44 = vpop.eup %1287  ;;  %1307 = vlog2.f32 %v960_v12  ;;  %v963_v51 = vadd.f32 1.0, %v1286_v31 }
 0x2db   : > { %v1290_v54 = vpop.eup %1289  ;;  %1028 = vst.msk [vmem:[%s1959_s11 + $0x50] sm:$0xff] %vm305_vm0, %v1012_v3  ;;  %v977_v55 = vmul.f32 0.6931472, %v1288_v44  ;;  %1309 = vrsqrt.f32 %v794_v27 }
 0x2dc   : > { %v1292_v18 = vpop.eup %1291  ;;  %v971_v0 = vmul.f32 0.6931472, %v1290_v54  ;;  %1311 = vlog2.f32 %v963_v51 }
 0x2dd   : > { %v1294_v53 = vpop.eup %1293  ;;  %v1005_v57 = vadd.f32 %v977_v55, %v877_v48  ;;  %v817_v58 = vmul.f32 %v1292_v18, %v1843_v15  ;;  %1313 = vrsqrt.f32 %v795_v19  ;;  %v881_v48 = vmax.f32 %v1947_v38, 0.0 }
 0x2de   : > { %v1296_v59 = vpop.eup %1295  ;;  %v1002_v9 = vadd.f32 %v971_v0, %v874_v47  ;;  %v824_v60 = vmul.f32 %v1294_v53, %v1851_v24 }
 0x2df   : > { %v1298_v33 = vpop.eup %1297  ;;  %1021 = vst.msk [vmem:[%s1959_s11 + $0x18] sm:$0xff] %vm305_vm0, %v1005_v57  ;;  %v993_v8 = vmul.f32 0.6931472, %v1296_v59  ;;  %v840_v56 = vmul.f32 %v1882_v63, %v817_v58  ;;  %v878_v57 = vmax.f32 %v1953_v40, 0.0 }
 0x2e0   : > { %v1300_v52 = vpop.eup %1299  ;;  %1018 = vst.msk [vmem:[%s1959_s11] sm:$0xff] %vm305_vm0, %v1002_v9  ;;  %v961_v50 = vadd.f32 1.0, %v1298_v33  ;;  %v847_v15 = vmul.f32 %v1882_v63, %v824_v60 }
 0x2e1   : > { %v1302_v22 = vpop.eup %1301  ;;  %v1013_v13 = vadd.f32 %v993_v8, %v885_v49  ;;  %v987_v24 = vmul.f32 0.6931472, %v1300_v52  ;;  %v1979_v23 = vadd.f32 %v1888_v7, %v840_v56 }
 0x2e2   : > { %v1304_v62 = vpop.eup %1303  ;;  %1315 = vlog2.f32 %v961_v50  ;;  %v958_v6 = vadd.f32 1.0, %v1302_v22  ;;  %v1982_v29 = vadd.f32 %v1888_v7, %v847_v15 }
 0x2e3   : > { %v1306_v61 = vpop.eup %1305  ;;  %1029 = vst.msk [vmem:[%s1959_s11 + $0x58] sm:$0xff] %vm305_vm0, %v1013_v13  ;;  %v1010_v20 = vadd.f32 %v987_v24, %v882_v2  ;;  %v973_v17 = vmul.f32 0.6931472, %v1304_v62  ;;  %v895_v4 = vand.u32 2147483647, %v1979_v23  ;;  %v879_v24 = vmax.f32 %v1979_v23, 0.0 }
 0x2e4   : > { %v1308_v16 = vpop.eup %1307  ;;  %1317 = vlog2.f32 %v958_v6  ;;  %v902_v11 = vand.u32 2147483647, %v1982_v29  ;;  %v825_v26 = vmul.f32 %v1306_v61, %v1855_v1  ;;  %v886_v6 = vmax.f32 %v1982_v29, 0.0 }
 0x2e5   : > { %v1310_v39 = vpop.eup %1309  ;;  %1026 = vst.msk [vmem:[%s1959_s11 + $0x40] sm:$0xff] %vm305_vm0, %v1010_v20  ;;  %v1003_v28 = vadd.f32 %v973_v17, %v875_v35  ;;  %v983_v36 = vmul.f32 0.6931472, %v1308_v16  ;;  %v911_v41 = vsub.f32 0.0, %v895_v4 }
 0x2e6   : > { %v1312_v46 = vpop.eup %1311  ;;  %v918_v37 = vsub.f32 0.0, %v902_v11  ;;  %v848_v10 = vmul.f32 %v1882_v63, %v825_v26  ;;  %v826_v14 = vmul.f32 %v1310_v39, %v1863_v42 }
 0x2e7   : > { %v1314_v30 = vpop.eup %1313  ;;  %1019 = vst.msk [vmem:[%s1959_s11 + $0x8] sm:$0xff] %vm305_vm0, %v1003_v28  ;;  %v1008_v1 = vadd.f32 %v983_v36, %v880_v25  ;;  %v989_v21 = vmul.f32 0.6931472, %v1312_v46  ;;  %v932_v34 = vmul.f32 1.442695, %v911_v41 }
 0x2e8   : > { %v946_v27 = vmul.f32 1.442695, %v918_v37  ;;  %v1999_v32 = vadd.f32 %v1888_v7, %v848_v10  ;;  %v849_v12 = vmul.f32 %v1882_v63, %v826_v14  ;;  %v827_v31 = vmul.f32 %v1314_v30, %v1867_v43 }
 0x2e9   : > { %1024 = vst.msk [vmem:[%s1959_s11 + $0x30] sm:$0xff] %vm305_vm0, %v1008_v1  ;;  %v1011_v42 = vadd.f32 %v989_v21, %v883_v45  ;;  %1319 = vpow2.f32 %v932_v34 }
 0x2ea   : > { %1321 = vpow2.f32 %v946_v27  ;;  %v903_v3 = vand.u32 2147483647, %v1999_v32  ;;  %v872_v19 = vadd.f32 %v1888_v7, %v849_v12  ;;  %v850_v5 = vmul.f32 %v1882_v63, %v827_v31 }
 0x2eb   : > { %1027 = vst.msk [vmem:[%s1959_s11 + $0x48] sm:$0xff] %vm305_vm0, %v1011_v42  ;;  %v887_v4 = vmax.f32 %v1999_v32, 0.0 }
 0x2ec   : > { %v1316_v44 = vpop.eup %1315  ;;  %v919_v51 = vsub.f32 0.0, %v903_v3  ;;  %v904_v54 = vand.u32 2147483647, %v872_v19  ;;  %v873_v55 = vadd.f32 %v1888_v7, %v850_v5  ;;  %v888_v26 = vmax.f32 %v872_v19, 0.0 }
 0x2ed   : > { %v985_v43 = vmul.f32 0.6931472, %v1316_v44 }
 0x2ee   : > { %v1318_v18 = vpop.eup %1317  ;;  %v948_v47 = vmul.f32 1.442695, %v919_v51  ;;  %v920_v0 = vsub.f32 0.0, %v904_v54  ;;  %v905_v59 = vand.u32 2147483647, %v873_v55  ;;  %v889_v25 = vmax.f32 %v873_v55, 0.0 }
 0x2ef   : > { %v1009_v53 = vadd.f32 %v985_v43, %v881_v48  ;;  %v979_v58 = vmul.f32 0.6931472, %v1318_v18 }
 0x2f0   : > { %1323 = vpow2.f32 %v948_v47  ;;  %v950_v63 = vmul.f32 1.442695, %v920_v0  ;;  %v921_v60 = vsub.f32 0.0, %v905_v59 }
 0x2f1   : > { %1025 = vst.msk [vmem:[%s1959_s11 + $0x38] sm:$0xff] %vm305_vm0, %v1009_v53  ;;  %v1006_v9 = vadd.f32 %v979_v58, %v878_v57 }
 0x2f2   : > { %1325 = vpow2.f32 %v950_v63  ;;  %v952_v33 = vmul.f32 1.442695, %v921_v60 }
 0x2f3   : > { %v1320_v38 = vpop.eup %1319  ;;  %1022 = vst.msk [vmem:[%s1959_s11 + $0x20] sm:$0xff] %vm305_vm0, %v1006_v9 }
 0x2f4   : > { %v1322_v7 = vpop.eup %1321  ;;  %v959_v49 = vadd.f32 1.0, %v1320_v38  ;;  %1327 = vpow2.f32 %v952_v33 }
 0x2f5   : > { %v966_v8 = vadd.f32 1.0, %v1322_v7 }
 0x2f6   : > { %1329 = vlog2.f32 %v959_v49 }
 0x2f7   : > { %1331 = vlog2.f32 %v966_v8 }
 0x2fa   : > { %v1324_v40 = vpop.eup %1323 }
 0x2fb   : > { %v967_v56 = vadd.f32 1.0, %v1324_v40 }
 0x2fc   : > { %v1326_v52 = vpop.eup %1325 }
 0x2fd   : > { %1333 = vlog2.f32 %v967_v56  ;;  %v968_v50 = vadd.f32 1.0, %v1326_v52 }
 0x2fe   : > { %v1328_v15 = vpop.eup %1327 }
 0x2ff   : > { %1335 = vlog2.f32 %v968_v50  ;;  %v969_v13 = vadd.f32 1.0, %v1328_v15 }
 0x300   : > { %v1330_v22 = vpop.eup %1329 }
 0x301   : > { %v1332_v2 = vpop.eup %1331  ;;  %v981_v62 = vmul.f32 0.6931472, %v1330_v22  ;;  %1337 = vlog2.f32 %v969_v13 }
 0x302   : > { %v995_v61 = vmul.f32 0.6931472, %v1332_v2 }
 0x303   : > { %v1007_v20 = vadd.f32 %v981_v62, %v879_v24 }
 0x304   : > { %v1014_v35 = vadd.f32 %v995_v61, %v886_v6 }
 0x305   : > { %1023 = vst.msk [vmem:[%s1959_s11 + $0x28] sm:$0xff] %vm305_vm0, %v1007_v20 }
 0x306   : > { %1030 = vst.msk [vmem:[%s1959_s11 + $0x60] sm:$0xff] %vm305_vm0, %v1014_v35 }
 0x307   : > { %v1334_v17 = vpop.eup %1333 }
 0x308   : > { %v997_v16 = vmul.f32 0.6931472, %v1334_v17 }
 0x309   : > { %v1336_v23 = vpop.eup %1335 }
 0x30a   : > { %v1015_v11 = vadd.f32 %v997_v16, %v887_v4  ;;  %v999_v29 = vmul.f32 0.6931472, %v1336_v23 }
 0x30b   : > { %v1338_v39 = vpop.eup %1337 }
 0x30c   : > { %1031 = vst.msk [vmem:[%s1959_s11 + $0x68] sm:$0xff] %vm305_vm0, %v1015_v11  ;;  %v1016_v28 = vadd.f32 %v999_v29, %v888_v26  ;;  %v1001_v36 = vmul.f32 0.6931472, %v1338_v39 }
 0x30e   : > { %1032 = vst.msk [vmem:[%s1959_s11 + $0x70] sm:$0xff] %vm305_vm0, %v1016_v28  ;;  %v1017_v41 = vadd.f32 %v1001_v36, %v889_v25 }
 0x310   : > { %1033 = vst.msk [vmem:[%s1959_s11 + $0x78] sm:$0xff] %vm305_vm0, %v1017_v41 }
 0x311   : > { %1352 = shalt.err (!%p1349_p3)
}
 0x312   : > { %s1353_s30 = scalar_lea.hbm %s2033_s16, 2048  ;;  %s1357_s8 = scalar_lea.hbm %s2087_s5, 8192 }
 0x313   : > { %p1354_p4 = scmp.ne.s32.totalorder %s2033_s16, %s1353_s30  ;;  %p1358_p9 = scmp.lt.u32.totalorder %s2033_s16, %s2087_s5 }
 0x314   : > { %p1359_p10 = scmp.lt.u32.totalorder %s1357_s8, %s1353_s30  ;;  %p1361_p12 = scmp.lt.u32.totalorder %s1353_s30, %s2033_s16 }
 0x315   : > { %p1355_p7 = pnand %p1354_p4, %p1475_p5 }
 0x316   : > { %p1360_p11 = por %p1359_p10, %p1358_p9 }
 0x317   : > { %p1356_p8 = pneg %p1355_p7 }
 0x318   : > { %p1362_p13 = por %p1361_p12, %p1360_p11 }
 0x31a   : > { %p1363_p0 = pnand %p1362_p13, %p1356_p8 }
 0x31c   : > { %1366 = shalt.err (!%p1363_p0)
}
 0x31d   : > { %s1405_s11 = smov 128   ;;  %s1406_s12 = smov 8  }
 0x31e   : > { %1195 = dma.vmem_to_hbm [thread:$0]  (%p1475_p5), %s2035_s13, 2048, %s2033_s16, %s2041_s22, %s1405_s11, %s1405_s11, %s1406_s12  }
 0x31f PF: > { %p1201_p1 = scmp.ge.s32.totalorder %s1401_s21, 2  ;;  %s1063_s14 = sand.u32 1, %s1389_s18  }
 0x320   : > { %s1064_s15 = scalar_lea.sflag [#allocation3], %s1063_s14 }
 0x321   : > { %p1198_p2 = pnand %p1201_p1, %p1479_p6 }
 0x323   : > { %1384 = dma.done.wait (!%p1198_p2), %s1064_s15, 2048  }
 0x324   : > { %1386 = vsyncadd (!%p1198_p2), %s1064_s15, 4294965248  ;;  %p15_p3 = scmp.ge.s32.totalorder %s1462_s24, 6   ;;  %s2090_s18 = smov %s1393_s19 }
 0x325   : > { %s2091_s19 = smov %s1397_s20  ;;  %s2092_s20 = smov %s1473_s27 }
 0x326   : > { %s2093_s21 = smov %s1462_s24  ;;  %17 = sbr.rel (!%p15_p3) target bundleno = 3 (0x3), region = 78 }
 0x32d   :  { %1069 = vsyncpa [#allocation3], 1 }
 0x32e   :  { %1071 = vsyncpa [#allocation3 + $0x1], 1 }

</bundles_post_ra>
